<compile_context>
chip_gen: v7x
topology: tpu7x:2x2x1
jax: 0.10.0
libtpu: 0.0.40
codegen_flags: <defaults>
</compile_context>

<pallas_src>
import functools

import jax
import jax.numpy as jnp
from jax import lax
from jax.experimental import pallas as pl
from jax.experimental.pallas import tpu as pltpu


def incept_block_c_kernel(x_ref, w1_ref, b1_ref, w2_ref, b2_ref, o_ref, y_scr,
                          *, H, W, taps):
    """One batch element per grid step.

    x_ref : (1, H*W, Cin)         bf16  input activations (channels minor)
    w1_ref: (Cin, Cout)           bf16  1x1 conv weight, BN1 scale folded in
    b1_ref: (1, Cout)             f32   BN1 folded bias
    w2_ref: (taps*Cout, Cout)     bf16  (5,1) conv weight (im2col layout), BN2 scale folded in
    b2_ref: (1, Cout)             f32   BN2 folded bias
    o_ref : (1, H*W, Cout)        f32   output activations
    y_scr : ((H+taps-1)*W, Cout)  bf16  VMEM halo scratch holding conv1 output
    """
    HW = H * W
    pad = (taps - 1) // 2           # 2 for a 5-tap kernel
    halo = pad * W                  # padded rows, flattened to (row*W) units

    # ---- conv1: 1x1 conv == channel matmul on the MXU (bf16 in, f32 acc);
    #      BN1 scale is already folded into w1, so only bias + ReLU remain.
    x = x_ref[0]                                              # (H*W, Cin)
    y = jnp.dot(x, w1_ref[...], preferred_element_type=jnp.float32)
    y = jnp.maximum(y + b1_ref[...], 0.0)                     # (H*W, Cout) f32

    # ---- write conv1 output into the halo scratch.  The scratch is the
    #      (H + 2*pad, W) padded image flattened to rows; zero halo rows
    #      implement the (2, 0) padding of the second conv.  Halos are
    #      re-zeroed every step (no cross-step carry -> megacore safe).
    zero_halo = jnp.zeros((halo, y_scr.shape[-1]), y_scr.dtype)
    y_scr[0:halo, :] = zero_halo
    y_scr[halo + HW:halo + HW + halo, :] = zero_halo
    y_scr[halo:halo + HW, :] = y.astype(y_scr.dtype)

    # ---- conv2: (taps, 1) conv, padding (pad, 0) == im2col along H.  A shift
    #      of one H-row is a shift of W flattened rows, so tap k is the static
    #      window y_scr[k*W : k*W + H*W].  All taps are fused into a single
    #      MXU contraction with K = taps*Cout (no per-tap VPU accumulation).
    lhs = jnp.concatenate(
        [y_scr[k * W:k * W + HW, :] for k in range(taps)], axis=-1)
    z = jnp.dot(lhs, w2_ref[...], preferred_element_type=jnp.float32)
    o_ref[0] = jnp.maximum(z + b2_ref[...], 0.0)              # (H*W, Cout) f32


def fold_bn(gamma, beta, mean, var, eps=1e-5):
    scale = gamma / jnp.sqrt(var + eps)
    bias = beta - mean * scale
    return scale, bias


def incept_block_c(x_nchw, params):
    """x_nchw: (N, Cin, H, W) f32 -> (N, Cout, H, W) f32 (PyTorch eval semantics)."""
    (w1_t, g1, be1, m1, v1, w2_t, g2, be2, m2, v2) = params
    N, Cin, H, W = x_nchw.shape
    Cout = w1_t.shape[0]
    KH = w2_t.shape[2]                       # 5
    HW = H * W

    # Fold inference-mode BatchNorm into per-output-channel weight scale + bias.
    s1, b1 = fold_bn(g1, be1, m1, v1)
    s2, b2 = fold_bn(g2, be2, m2, v2)
    # torch conv1 weight (Cout, Cin, 1, 1) -> (Cin, Cout), BN1 scale folded in.
    w1 = (jnp.transpose(w1_t[:, :, 0, 0], (1, 0)) * s1[None, :]).astype(jnp.bfloat16)
    # torch conv2 weight (Cout, Cin2=Cout, KH, 1) -> (KH, Cin2, Cout) ->
    # (KH*Cin2, Cout), matching the kernel's im2col column order
    # (tap-major, channel-minor), BN2 scale folded in.
    w2 = jnp.transpose(w2_t[:, :, :, 0], (2, 1, 0)) * s2[None, None, :]
    w2 = w2.reshape(KH * Cout, Cout).astype(jnp.bfloat16)
    b1 = b1.reshape(1, Cout).astype(jnp.float32)
    b2 = b2.reshape(1, Cout).astype(jnp.float32)

    # NCHW -> channels-minor (N, H*W, Cin), bf16 for the MXU.
    # TODO(synk): keep the surrounding model channels-minor end to end so this
    # relayout (and the inverse below) disappears from the hot path.
    x = jnp.transpose(x_nchw, (0, 2, 3, 1)).reshape(N, HW, Cin).astype(jnp.bfloat16)

    kernel = functools.partial(incept_block_c_kernel, H=H, W=W, taps=KH)

    flops = 2 * N * HW * Cout * (Cin + KH * Cout)
    bytes_accessed = (x.size * 2 + N * HW * Cout * 4
                      + w1.size * 2 + w2.size * 2 + b1.size * 4 + b2.size * 4)

    out = pl.pallas_call(
        kernel,
        out_shape=jax.ShapeDtypeStruct((N, HW, Cout), jnp.float32),
        grid_spec=pltpu.PrefetchScalarGridSpec(
            num_scalar_prefetch=0,
            grid=(N,),                                    # one image per step
            in_specs=[
                pl.BlockSpec((1, HW, Cin), lambda n: (n, 0, 0)),
                pl.BlockSpec((Cin, Cout), lambda n: (0, 0)),
                pl.BlockSpec((1, Cout), lambda n: (0, 0)),
                pl.BlockSpec((KH * Cout, Cout), lambda n: (0, 0)),
                pl.BlockSpec((1, Cout), lambda n: (0, 0)),
            ],
            out_specs=pl.BlockSpec((1, HW, Cout), lambda n: (n, 0, 0)),
            scratch_shapes=[pltpu.VMEM(((H + KH - 1) * W, Cout), jnp.bfloat16)],
        ),
        compiler_params=pltpu.CompilerParams(
            # Batch axis is independent -> megacore-shardable on v7x.
            dimension_semantics=("parallel",),
            # Per-step footprint (double-buffered x/out blocks + weights +
            # halo scratch) is far below this cap; keep the limit explicit so
            # it also fits v7x's 64 MiB physical / v5e's small default.
            vmem_limit_bytes=32 * 1024 * 1024,
        ),
        cost_estimate=pl.CostEstimate(
            flops=flops, transcendentals=0, bytes_accessed=bytes_accessed),
    )(x, w1, b1, w2, b2)

    # channels-minor -> NCHW (match PyTorch).
    return jnp.transpose(out.reshape(N, H, W, Cout), (0, 3, 1, 2))


def reference_forward(x_nchw, params):
    """Pure-f32 reference with the PyTorch module's eval() semantics."""
    (w1_t, g1, be1, m1, v1, w2_t, g2, be2, m2, v2) = params

    def bn_relu(y, g, b, m, v, eps=1e-5):
        g = g[None, :, None, None]; b = b[None, :, None, None]
        m = m[None, :, None, None]; v = v[None, :, None, None]
        return jnp.maximum((y - m) / jnp.sqrt(v + eps) * g + b, 0.0)

    dn = ('NCHW', 'OIHW', 'NCHW')
    y = lax.conv_general_dilated(x_nchw, w1_t, (1, 1), 'VALID', dimension_numbers=dn)
    y = bn_relu(y, g1, be1, m1, v1)
    z = lax.conv_general_dilated(y, w2_t, (1, 1), [(2, 2), (0, 0)], dimension_numbers=dn)
    return bn_relu(z, g2, be2, m2, v2)


def reference_forward_matched(x_nchw, params):
    """Reference matching the kernel numerics (bf16 MXU inputs, f32 accumulation)."""
    (w1_t, g1, be1, m1, v1, w2_t, g2, be2, m2, v2) = params
    s1, b1 = fold_bn(g1, be1, m1, v1)
    s2, b2 = fold_bn(g2, be2, m2, v2)
    w1f = (w1_t * s1[:, None, None, None]).astype(jnp.bfloat16)
    w2f = (w2_t * s2[:, None, None, None]).astype(jnp.bfloat16)
    dn = ('NCHW', 'OIHW', 'NCHW')
    y = lax.conv_general_dilated(x_nchw.astype(jnp.bfloat16), w1f, (1, 1), 'VALID',
                                 dimension_numbers=dn,
                                 preferred_element_type=jnp.float32)
    y = jnp.maximum(y + b1[None, :, None, None], 0.0)
    z = lax.conv_general_dilated(y.astype(jnp.bfloat16), w2f, (1, 1),
                                 [(2, 2), (0, 0)], dimension_numbers=dn,
                                 preferred_element_type=jnp.float32)
    return jnp.maximum(z + b2[None, :, None, None], 0.0)


def init_params(key, in_channels, out_channels):
    ks = jax.random.split(key, 10)
    w1 = 0.2 * jax.random.normal(ks[0], (out_channels, in_channels, 1, 1), jnp.float32)
    g1 = 1.0 + 0.1 * jax.random.normal(ks[1], (out_channels,), jnp.float32)
    be1 = 0.1 * jax.random.normal(ks[2], (out_channels,), jnp.float32)
    m1 = 0.05 * jax.random.normal(ks[3], (out_channels,), jnp.float32)
    v1 = 1.0 + 0.1 * jax.random.uniform(ks[4], (out_channels,), jnp.float32)
    w2 = 0.2 * jax.random.normal(ks[5], (out_channels, out_channels, 5, 1), jnp.float32)
    g2 = 1.0 + 0.1 * jax.random.normal(ks[6], (out_channels,), jnp.float32)
    be2 = 0.1 * jax.random.normal(ks[7], (out_channels,), jnp.float32)
    m2 = 0.05 * jax.random.normal(ks[8], (out_channels,), jnp.float32)
    v2 = 1.0 + 0.1 * jax.random.uniform(ks[9], (out_channels,), jnp.float32)
    return (w1, g1, be1, m1, v1, w2, g2, be2, m2, v2)


if __name__ == "__main__":
    key = jax.random.PRNGKey(0)
    k_x, k_p = jax.random.split(key)

    N, Cin, Cout, H, W = 2, 4, 8, 16, 16
    x = jax.random.normal(k_x, (N, Cin, H, W), jnp.float32)
    params = init_params(k_p, Cin, Cout)

    out = jax.block_until_ready(jax.jit(incept_block_c)(x, params))
    assert out.shape == (N, Cout, H, W), out.shape

    # Tight check against a reference with identical numerics (bf16 matmul
    # inputs, f32 accumulation) -- validates the kernel logic itself.
    ref_m = jax.block_until_ready(reference_forward_matched(x, params))
    err_m = float(jnp.abs(out - ref_m).max())
    assert jnp.allclose(out, ref_m, atol=2e-3, rtol=2e-3), err_m

    # Loose check against the pure-f32 PyTorch-eval reference; the residual is
    # bf16 input/weight quantization only.
    ref = jax.block_until_ready(reference_forward(x, params))
    err = float(jnp.abs(out - ref).max())
    assert jnp.allclose(out, ref, atol=5e-2, rtol=5e-2), err

    print("KERNEL_OK")
</pallas_src>

<mosaic_0001>
module attributes {stable_mosaic.version = 11 : i64} {
  func.func @incept_block_c_kernel(%arg0: i32, %arg1: memref<1x256x4xbf16, #tpu.memory_space<vmem>>, %arg2: memref<4x8xbf16, #tpu.memory_space<vmem>>, %arg3: memref<1x8xf32, #tpu.memory_space<vmem>>, %arg4: memref<40x8xbf16, #tpu.memory_space<vmem>>, %arg5: memref<1x8xf32, #tpu.memory_space<vmem>>, %arg6: memref<1x256x8xf32, #tpu.memory_space<vmem>>, %arg7: memref<320x8xbf16, #tpu.memory_space<vmem>>) attributes {dimension_semantics = [#tpu.dimension_semantics<parallel>], iteration_bounds = array<i64: 2>, scalar_prefetch = 0 : i64, scratch_operands = 1 : i64, tpu.core_type = #tpu.core_type<tc>, window_params = [{transform_indices = @transform_0, window_bounds = array<i64: 1, 256, 4>}, {pipeline_mode = #tpu.pipeline_mode<synchronous>, transform_indices = @transform_1, window_bounds = array<i64: 4, 8>}, {pipeline_mode = #tpu.pipeline_mode<synchronous>, transform_indices = @transform_2, window_bounds = array<i64: 1, 8>}, {pipeline_mode = #tpu.pipeline_mode<synchronous>, transform_indices = @transform_3, window_bounds = array<i64: 40, 8>}, {pipeline_mode = #tpu.pipeline_mode<synchronous>, transform_indices = @transform_4, window_bounds = array<i64: 1, 8>}, {transform_indices = @transform_5, window_bounds = array<i64: 1, 256, 8>}]} {
    %c0 = arith.constant 0 : index
    %c0_0 = arith.constant 0 : index
    %c0_1 = arith.constant 0 : index
    %0 = vector.load %arg1[%c0, %c0_0, %c0_1] : memref<1x256x4xbf16, #tpu.memory_space<vmem>>, vector<1x256x4xbf16>
    %1 = vector.shape_cast %0 : vector<1x256x4xbf16> to vector<256x4xbf16>
    %c0_2 = arith.constant 0 : index
    %c0_3 = arith.constant 0 : index
    %2 = vector.load %arg2[%c0_2, %c0_3] : memref<4x8xbf16, #tpu.memory_space<vmem>>, vector<4x8xbf16>
    %cst = arith.constant dense<0.000000e+00> : vector<256x8xf32>
    %3 = tpu.matmul %1, %2, %cst {dimension_numbers = #tpu.dot_dimension_numbers<[1], [0], [0], [1], [0, 0, 1, 1], [], []>} : vector<256x4xbf16>, vector<4x8xbf16>, vector<256x8xf32> -> vector<256x8xf32>
    %c0_4 = arith.constant 0 : index
    %c0_5 = arith.constant 0 : index
    %4 = vector.load %arg3[%c0_4, %c0_5] : memref<1x8xf32, #tpu.memory_space<vmem>>, vector<1x8xf32>
    %5 = vector.broadcast %4 : vector<1x8xf32> to vector<256x8xf32>
    %6 = arith.addf %3, %5 : vector<256x8xf32>
    %cst_6 = arith.constant 0.000000e+00 : f32
    %7 = vector.broadcast %cst_6 : f32 to vector<256x8xf32>
    %8 = arith.maximumf %6, %7 : vector<256x8xf32>
    %cst_7 = arith.constant 0.000000e+00 : bf16
    %9 = vector.broadcast %cst_7 : bf16 to vector<32x8xbf16>
    %c0_8 = arith.constant 0 : index
    %c0_9 = arith.constant 0 : index
    %10 = vector.load %arg7[%c0_8, %c0_9] : memref<320x8xbf16, #tpu.memory_space<vmem>>, vector<32x8xbf16>
    tpu.vector_store %arg7[%c0_8, %c0_9], %9 {strides = array<i32>} : memref<320x8xbf16, #tpu.memory_space<vmem>>, vector<32x8xbf16>,
    %c288 = arith.constant 288 : index
    %c0_10 = arith.constant 0 : index
    %11 = vector.load %arg7[%c288, %c0_10] : memref<320x8xbf16, #tpu.memory_space<vmem>>, vector<32x8xbf16>
    tpu.vector_store %arg7[%c288, %c0_10], %9 {strides = array<i32>} : memref<320x8xbf16, #tpu.memory_space<vmem>>, vector<32x8xbf16>,
    %12 = arith.truncf %8 : vector<256x8xf32> to vector<256x8xbf16>
    %c32 = arith.constant 32 : index
    %c0_11 = arith.constant 0 : index
    %13 = vector.load %arg7[%c32, %c0_11] : memref<320x8xbf16, #tpu.memory_space<vmem>>, vector<256x8xbf16>
    tpu.vector_store %arg7[%c32, %c0_11], %12 {strides = array<i32>} : memref<320x8xbf16, #tpu.memory_space<vmem>>, vector<256x8xbf16>,
    %c0_12 = arith.constant 0 : index
    %c0_13 = arith.constant 0 : index
    %14 = vector.load %arg7[%c0_12, %c0_13] : memref<320x8xbf16, #tpu.memory_space<vmem>>, vector<256x8xbf16>
    %c16 = arith.constant 16 : index
    %c0_14 = arith.constant 0 : index
    %15 = vector.load %arg7[%c16, %c0_14] : memref<320x8xbf16, #tpu.memory_space<vmem>>, vector<256x8xbf16>
    %c32_15 = arith.constant 32 : index
    %c0_16 = arith.constant 0 : index
    %16 = vector.load %arg7[%c32_15, %c0_16] : memref<320x8xbf16, #tpu.memory_space<vmem>>, vector<256x8xbf16>
    %c48 = arith.constant 48 : index
    %c0_17 = arith.constant 0 : index
    %17 = vector.load %arg7[%c48, %c0_17] : memref<320x8xbf16, #tpu.memory_space<vmem>>, vector<256x8xbf16>
    %c64 = arith.constant 64 : index
    %c0_18 = arith.constant 0 : index
    %18 = vector.load %arg7[%c64, %c0_18] : memref<320x8xbf16, #tpu.memory_space<vmem>>, vector<256x8xbf16>
    %19 = tpu.concatenate %14, %15, %16, %17, %18 in 1 : vector<256x8xbf16>, vector<256x8xbf16>, vector<256x8xbf16>, vector<256x8xbf16>, vector<256x8xbf16> -> vector<256x40xbf16>
    %c0_19 = arith.constant 0 : index
    %c0_20 = arith.constant 0 : index
    %20 = vector.load %arg4[%c0_19, %c0_20] : memref<40x8xbf16, #tpu.memory_space<vmem>>, vector<40x8xbf16>
    %cst_21 = arith.constant dense<0.000000e+00> : vector<256x8xf32>
    %21 = tpu.matmul %19, %20, %cst_21 {dimension_numbers = #tpu.dot_dimension_numbers<[1], [0], [0], [1], [0, 0, 1, 1], [], []>} : vector<256x40xbf16>, vector<40x8xbf16>, vector<256x8xf32> -> vector<256x8xf32>
    %c0_22 = arith.constant 0 : index
    %c0_23 = arith.constant 0 : index
    %22 = vector.load %arg5[%c0_22, %c0_23] : memref<1x8xf32, #tpu.memory_space<vmem>>, vector<1x8xf32>
    %23 = vector.broadcast %22 : vector<1x8xf32> to vector<256x8xf32>
    %24 = arith.addf %21, %23 : vector<256x8xf32>
    %cst_24 = arith.constant 0.000000e+00 : f32
    %25 = vector.broadcast %cst_24 : f32 to vector<256x8xf32>
    %26 = arith.maximumf %24, %25 : vector<256x8xf32>
    %c0_25 = arith.constant 0 : index
    %c0_26 = arith.constant 0 : index
    %c0_27 = arith.constant 0 : index
    %27 = vector.load %arg6[%c0_25, %c0_26, %c0_27] : memref<1x256x8xf32, #tpu.memory_space<vmem>>, vector<1x256x8xf32>
    %28 = vector.shape_cast %27 : vector<1x256x8xf32> to vector<256x8xf32>
    %29 = vector.shape_cast %26 : vector<256x8xf32> to vector<1x256x8xf32>
    tpu.vector_store %arg6[%c0_25, %c0_26, %c0_27], %29 {strides = array<i32>} : memref<1x256x8xf32, #tpu.memory_space<vmem>>, vector<1x256x8xf32>,
    return
  }
  func.func @transform_0(%arg0: i32) -> (i32, i32, i32) {
    %c0_i32 = arith.constant 0 : i32
    %c0_i32_0 = arith.constant 0 : i32
    %c0_i32_1 = arith.constant 0 : i32
    return %arg0, %c0_i32, %c0_i32_0 : i32, i32, i32
  }
  func.func @transform_1(%arg0: i32) -> (i32, i32) {
    %c0_i32 = arith.constant 0 : i32
    %c0_i32_0 = arith.constant 0 : i32
    %c0_i32_1 = arith.constant 0 : i32
    return %c0_i32, %c0_i32_0 : i32, i32
  }
  func.func @transform_2(%arg0: i32) -> (i32, i32) {
    %c0_i32 = arith.constant 0 : i32
    %c0_i32_0 = arith.constant 0 : i32
    %c0_i32_1 = arith.constant 0 : i32
    return %c0_i32, %c0_i32_0 : i32, i32
  }
  func.func @transform_3(%arg0: i32) -> (i32, i32) {
    %c0_i32 = arith.constant 0 : i32
    %c0_i32_0 = arith.constant 0 : i32
    %c0_i32_1 = arith.constant 0 : i32
    return %c0_i32, %c0_i32_0 : i32, i32
  }
  func.func @transform_4(%arg0: i32) -> (i32, i32) {
    %c0_i32 = arith.constant 0 : i32
    %c0_i32_0 = arith.constant 0 : i32
    %c0_i32_1 = arith.constant 0 : i32
    return %c0_i32, %c0_i32_0 : i32, i32
  }
  func.func @transform_5(%arg0: i32) -> (i32, i32, i32) {
    %c0_i32 = arith.constant 0 : i32
    %c0_i32_0 = arith.constant 0 : i32
    %c0_i32_1 = arith.constant 0 : i32
    return %arg0, %c0_i32, %c0_i32_0 : i32, i32, i32
  }
}

</mosaic_0001>

<bundles_post_ra>
// kernel: incept_block_c.1
= control target key start
LH: loop header
LB: loop body
LE: loop exit
PB: predicated region body
PF: predicated region fallthrough
CT: control target
= control target key end

     0   :  { %s1538_s18 = smov 0   ;;  %s2008_s0 = inlined_call_operand.vmem [shape: bf16[2,256,4], index: 0, kind: input, shape index: {}]   ;;  %s2009_s1 = inlined_call_operand.vmem [shape: bf16[4,8], index: 1, kind: input, shape index: {}]   ;;  %s2010_s2 = inlined_call_operand.vmem [shape: f32[1,8], index: 2, kind: input, shape index: {}]   ;;  %s2011_s3 = inlined_call_operand.vmem [shape: bf16[40,8], index: 3, kind: input, shape index: {}]   ;;  %s2012_s4 = inlined_call_operand.vmem [shape: f32[1,8], index: 4, kind: input, shape index: {}]   ;;  %s2013_s5 = inlined_call_operand.vmem [shape: f32[2,256,8], index: 5, kind: output, shape index: {}]  }
   0x1 LB: > { %s1287_s19 = sadd.s32 4294967295, %s1501_s18   ;;  %p1291_p0 = scmp.ge.s32.totalorder %s1501_s18, 1  ;;  %s1501_s18 = sphi %s1538_s18, %s15_s18  }
   0x2   : > { %p187_p1 = scmp.lt.s32.totalorder %s1501_s18, 3 }
   0x4   : > { %p188_p2 = pnand %p1291_p0, %p187_p1 }
   0x5   : > { %v258_v0 = vld [vmem:[%s2009_s1] sm:$0x3] (!%p188_p2)  ;;  %vm395_vm0 = vcmask (!%p188_p2), 1041408   ;;  %p215_p3 = scmp.lt.s32.totalorder (!%p188_p2), %s1287_s19, 1  ;;  %vm346_vm1 = vcmask (!%p188_p2), 31744   ;;  %vm592_vm2 = vcmask (!%p188_p2), 64512  }
   0x6   : > { %191 = sbr.rel (%p188_p2) target bundleno = 706 (0x2c2), region = 40  ;;  %1461 = vmatprep.subr.msk.bf16.mxu0 (!%p188_p2), %vm395_vm0, %v258_v0  ;;  %v397_v1 = vsel (!%p188_p2), %vm395_vm0, %v258_v0, 0  ;;  %v1503_v18 = vmov (!%p188_p2), 0   ;;  %s1504_s26 = smov (!%p188_p2), 8   ;;  %v1600_v20 = vld [vmem:[%s2010_s2] ss:$0 sm:$0xff] (!%p188_p2) }
   0x7   : > { %1390 = vmatpush3.bf16.msra.mxu0 (!%p188_p2), %v397_v1  ;;  %594 = vst.msk [vmem:[#allocation2 + $0x8] sm:$0xff] (!%p188_p2), %vm592_vm2, %v1503_v18  ;;  %593 = vst.msk [vmem:[#allocation2] sm:$0xff] (!%p188_p2), %vm592_vm2, %v1503_v18  ;;  %v1492_v43 = vld [vmem:[%s2011_s3] sm:$0xff] (!%p188_p2)   ;;  %v1493_v49 = vld [vmem:[%s2011_s3 + $0x8] sm:$0xff] (!%p188_p2)   ;;  %s1505_s8 = smov (!%p188_p2), 24   ;;  %s1506_s9 = smov (!%p188_p2), 16  }
   0x8   : > { %595 = vst.msk [vmem:[#allocation2 + $0x90] sm:$0xff] (!%p188_p2), %vm592_vm2, %v1503_v18  ;;  %596 = vst.msk [vmem:[#allocation2 + $0x98] sm:$0xff] (!%p188_p2), %vm592_vm2, %v1503_v18  ;;  %1423 = vmatprep.subr.bf16.mxu1 (!%p188_p2), %v1492_v43  ;;  %v1494_v63 = vld [vmem:[%s2011_s3 + $0x10] ss:$0 sps:$4 sm:$0xff] (!%p188_p2)   ;;  %vm1003_vm3 = vcmask (!%p188_p2), 1043456   ;;  %s1507_s12 = smov (!%p188_p2), 32  }
   0x9   : > { %1424 = vmatpush3.bf16.msra.mxu1 (!%p188_p2), %v1492_v43  ;;  %vm844_vm4 = vcmask (!%p188_p2), 130048   ;;  %vm877_vm5 = vcmask (!%p188_p2), 195584   ;;  %vm910_vm6 = vcmask (!%p188_p2), 261120   ;;  %vm970_vm7 = vcmask (!%p188_p2), 326656  }
   0xa   : > { %1425 = vmatprep.subr.bf16.mxu1 (!%p188_p2), %v1493_v49 }
   0xd   : > { %s2015_s19 = smov (!%p215_p3, %s1287_s19), 1  ;;  %1426 = vmatpush3.bf16.msra.mxu1 %v1493_v49 }
   0xe   : > { %s1351_s22 = sshll.u32 %s2015_s19, 7  ;;  %v1593_v19 = vld [vmem:[#allocation2 + $0x8] sm:$0xff]  ;;  %1462 = vmatprep.subr.msk.bf16.mxu1 %vm1003_vm3, %v1494_v63  ;;  %s1352_s15 = sshll.u32 %s2015_s19, 8 }
   0xf   : > { %s1555_s25 = scalar_lea.vmem %s2008_s0, %s1351_s22  ;;  %665 = vrot.lane.b32.xlu0 %v1593_v19, %s1504_s26  ;;  %s1908_s20 = scalar_lea.vmem %s2013_s5, %s1352_s15 }
  0x10   : > { %v1476_v2 = vld [vmem:[%s1555_s25] sm:$0xff]   ;;  %v1477_v3 = vld [vmem:[%s1555_s25 + $0x8] sm:$0xff]   ;;  %v1478_v4 = vld [vmem:[%s1555_s25 + $0x10] sm:$0xff]  }
  0x11   : > { %1391 = vmatprep.mubr.msk.bf16.mxu0 %vm346_vm1, %v1476_v2  ;;  %v1479_v5 = vld [vmem:[%s1555_s25 + $0x18] sm:$0xff]   ;;  %v1480_v6 = vld [vmem:[%s1555_s25 + $0x20] sm:$0xff]   ;;  %v1481_v7 = vld [vmem:[%s1555_s25 + $0x28] sm:$0xff]   ;;  %v1005_v2 = vsel %vm1003_vm3, %v1494_v63, 0 }
  0x12   : > { %1392 = vmatmul.mubr.msk.bf16.vlgmr.msra.gmra.mrb[0].mxu0 %vm346_vm1, %v1477_v3  ;;  %v1482_v8 = vld [vmem:[%s1555_s25 + $0x30] sm:$0xff]   ;;  %v1483_v9 = vld [vmem:[%s1555_s25 + $0x38] sm:$0xff]   ;;  %v1484_v10 = vld [vmem:[%s1555_s25 + $0x40] sm:$0xff]   ;;  %1428 = vmatpush3.bf16.msra.mxu1 %v1005_v2 }
  0x13   : > { %1395 = vmatprep.mubr.msk.bf16.mxu0 %vm346_vm1, %v1478_v4  ;;  %v1485_v11 = vld [vmem:[%s1555_s25 + $0x48] sm:$0xff]   ;;  %v1486_v12 = vld [vmem:[%s1555_s25 + $0x50] sm:$0xff]   ;;  %v1487_v13 = vld [vmem:[%s1555_s25 + $0x58] sm:$0xff]  }
  0x14   : > { %v1488_v14 = vld [vmem:[%s1555_s25 + $0x60] sm:$0xff]   ;;  %v1489_v15 = vld [vmem:[%s1555_s25 + $0x68] sm:$0xff]   ;;  %v1490_v16 = vld [vmem:[%s1555_s25 + $0x70] sm:$0xff]  }
  0x15   : > { %v1491_v17 = vld [vmem:[%s1555_s25 + $0x78] sm:$0xff]  }
  0x1a   : > { %1396 = vmatmul.mubr.msk.bf16.gmra.mrb[4].mxu0 %vm346_vm1, %v1479_v5 }
  0x1b   : > { %1399 = vmatprep.mubr.msk.bf16.mxu0 %vm346_vm1, %v1480_v6 }
  0x22   : > { %1400 = vmatmul.mubr.msk.bf16.gmra.mrb[8].mxu0 %vm346_vm1, %v1481_v7 }
  0x23   : > { %1403 = vmatprep.mubr.msk.bf16.mxu0 %vm346_vm1, %v1482_v8 }
  0x2a   : > { %1404 = vmatmul.mubr.msk.bf16.gmra.mrb[12].mxu0 %vm346_vm1, %v1483_v9 }
  0x2b   : > { %1407 = vmatprep.mubr.msk.bf16.mxu0 %vm346_vm1, %v1484_v10 }
  0x32   : > { %1408 = vmatmul.mubr.msk.bf16.gmra.mrb[16].mxu0 %vm346_vm1, %v1485_v11 }
  0x33   : > { %1411 = vmatprep.mubr.msk.bf16.mxu0 %vm346_vm1, %v1486_v12 }
  0x3a   : > { %1412 = vmatmul.mubr.msk.bf16.gmra.mrb[20].mxu0 %vm346_vm1, %v1487_v13 }
  0x3b   : > { %1415 = vmatprep.mubr.msk.bf16.mxu0 %vm346_vm1, %v1488_v14 }
  0x42   : > { %1416 = vmatmul.mubr.msk.bf16.gmra.mrb[24].mxu0 %vm346_vm1, %v1489_v15 }
  0x43   : > { %1419 = vmatprep.mubr.msk.bf16.mxu0 %vm346_vm1, %v1490_v16 }
  0x4a   : > { %1420 = vmatmul.mubr.msk.bf16.gmra.mrb[28].mxu0 %vm346_vm1, %v1491_v17 }
  0xe5   : > { %v1393_v21 = vpop.f32.mrb[0].mxu0 }
  0xe6   : > { %v442_v22 = vadd.f32 %v1393_v21, %v1600_v20  ;;  %v433_v23 = vpop.f32.mrb[1].mxu0 }
  0xe7   : > { %v434_v24 = vadd.f32 %v1600_v20, %v433_v23  ;;  %v1394_v25 = vpop.f32.mrb[2].mxu0 }
  0xe8   : > { %v445_v26 = vadd.f32 %v1394_v25, %v1600_v20  ;;  %v436_v27 = vpop.f32.mrb[3].mxu0  ;;  %v562_v29 = vmax.f32 %v442_v22, 0.0 }
  0xe9   : > { %v437_v28 = vadd.f32 %v1600_v20, %v436_v27  ;;  %v560_v31 = vmax.f32 %v434_v24, 0.0 }
  0xea   : > { %v563_v30 = vmax.f32 %v445_v26, 0.0 }
  0xeb   : > { %v561_v32 = vmax.f32 %v437_v28, 0.0 }
  0xec   : > { %v598_v33 = vpack.c.bf16 %v563_v30, %v562_v29 }
  0xed   : > { %v597_v34 = vpack.c.bf16 %v561_v32, %v560_v31  ;;  %v1397_v35 = vpop.f32.mrb[4].mxu0 }
  0xee   : > { %614 = vst.msk [vmem:[#allocation2 + $0x18] sm:$0xff] %vm592_vm2, %v598_v33  ;;  %v458_v36 = vadd.f32 %v1397_v35, %v1600_v20  ;;  %v449_v37 = vpop.f32.mrb[5].mxu0 }
  0xef   : > { %613 = vst.msk [vmem:[#allocation2 + $0x10] sm:$0xff] %vm592_vm2, %v597_v34  ;;  %v450_v38 = vadd.f32 %v1600_v20, %v449_v37  ;;  %v1398_v39 = vpop.f32.mrb[6].mxu0 }
  0xf0   : > { %v461_v40 = vadd.f32 %v1398_v39, %v1600_v20  ;;  %v452_v41 = vpop.f32.mrb[7].mxu0  ;;  %v566_v44 = vmax.f32 %v458_v36, 0.0 }
  0xf1   : > { %v453_v42 = vadd.f32 %v1600_v20, %v452_v41  ;;  %v564_v46 = vmax.f32 %v450_v38, 0.0 }
  0xf2   : > { %v567_v45 = vmax.f32 %v461_v40, 0.0 }
  0xf3   : > { %v565_v47 = vmax.f32 %v453_v42, 0.0 }
  0xf4   : > { %v600_v48 = vpack.c.bf16 %v567_v45, %v566_v44 }
  0xf5   : > { %v599_v50 = vpack.c.bf16 %v565_v47, %v564_v46  ;;  %v1618_v51 = vld [vmem:[#allocation2 + $0x18] sm:$0xff]  ;;  %v1401_v52 = vpop.f32.mrb[8].mxu0 }
  0xf6   : > { %616 = vst.msk [vmem:[#allocation2 + $0x28] sm:$0xff] %vm592_vm2, %v600_v48  ;;  %731 = vrot.lane.b32.xlu0 %v1618_v51, %s1505_s8  ;;  %700 = vrot.lane.b32.xlu1 %v1618_v51, %s1506_s9  ;;  %v474_v53 = vadd.f32 %v1401_v52, %v1600_v20  ;;  %v465_v54 = vpop.f32.mrb[9].mxu0  ;;  %v1629_v60 = vld [vmem:[#allocation2 + $0x10] sm:$0xff] }
  0xf7   : > { %615 = vst.msk [vmem:[#allocation2 + $0x20] sm:$0xff] %vm592_vm2, %v599_v50  ;;  %v466_v55 = vadd.f32 %v1600_v20, %v465_v54  ;;  %v1402_v56 = vpop.f32.mrb[10].mxu0 }
  0xf8   : > { %v570_v57 = vmax.f32 %v474_v53, 0.0  ;;  %v477_v58 = vadd.f32 %v1402_v56, %v1600_v20  ;;  %v468_v59 = vpop.f32.mrb[11].mxu0 }
  0xf9   : > { %v568_v61 = vmax.f32 %v466_v55, 0.0  ;;  %v469_v62 = vadd.f32 %v1600_v20, %v468_v59 }
  0xfa   : > { %669 = vrot.lane.b32.xlu0 %v1618_v51, %s1504_s26  ;;  %698 = vrot.lane.b32.xlu1 %v1629_v60, %s1506_s9  ;;  %v571_v0 = vmax.f32 %v477_v58, 0.0 }
  0xfb   : > { %v569_v1 = vmax.f32 %v469_v62, 0.0 }
  0xfc   : > { %v602_v3 = vpack.c.bf16 %v571_v0, %v570_v57 }
  0xfd   : > { %v601_v4 = vpack.c.bf16 %v569_v1, %v568_v61  ;;  %v1639_v5 = vld [vmem:[#allocation2 + $0x28] sm:$0xff]  ;;  %v1405_v6 = vpop.f32.mrb[12].mxu0 }
  0xfe   : > { %618 = vst.msk [vmem:[#allocation2 + $0x38] sm:$0xff] %vm592_vm2, %v602_v3  ;;  %766 = vrot.lane.b32.xlu1 %v1639_v5, %s1507_s12  ;;  %667 = vrot.lane.b32.xlu0 %v1629_v60, %s1504_s26  ;;  %v490_v7 = vadd.f32 %v1405_v6, %v1600_v20  ;;  %v481_v8 = vpop.f32.mrb[13].mxu0  ;;  %v1655_v21 = vld [vmem:[#allocation2 + $0x20] sm:$0xff] }
  0xff   : > { %617 = vst.msk [vmem:[#allocation2 + $0x30] sm:$0xff] %vm592_vm2, %v601_v4  ;;  %v482_v9 = vadd.f32 %v1600_v20, %v481_v8  ;;  %v1406_v10 = vpop.f32.mrb[14].mxu0 }
 0x100   : > { %v574_v11 = vmax.f32 %v490_v7, 0.0  ;;  %v493_v12 = vadd.f32 %v1406_v10, %v1600_v20  ;;  %v484_v13 = vpop.f32.mrb[15].mxu0 }
 0x101   : > { %v572_v14 = vmax.f32 %v482_v9, 0.0  ;;  %v485_v15 = vadd.f32 %v1600_v20, %v484_v13 }
 0x102   : > { %704 = vrot.lane.b32.xlu1 %v1639_v5, %s1506_s9  ;;  %735 = vrot.lane.b32.xlu0 %v1639_v5, %s1505_s8  ;;  %v575_v16 = vmax.f32 %v493_v12, 0.0 }
 0x103   : > { %v573_v17 = vmax.f32 %v485_v15, 0.0 }
 0x104   : > { %v604_v18 = vpack.c.bf16 %v575_v16, %v574_v11 }
 0x105   : > { %v603_v22 = vpack.c.bf16 %v573_v17, %v572_v14  ;;  %v1409_v23 = vpop.f32.mrb[16].mxu0  ;;  %v1671_v36 = vld [vmem:[#allocation2 + $0x38] sm:$0xff] }
 0x106   : > { %733 = vrot.lane.b32.xlu1 %v1655_v21, %s1505_s8  ;;  %673 = vrot.lane.b32.xlu0 %v1639_v5, %s1504_s26  ;;  %620 = vst.msk [vmem:[#allocation2 + $0x48] sm:$0xff] %vm592_vm2, %v604_v18  ;;  %v506_v24 = vadd.f32 %v1409_v23, %v1600_v20  ;;  %v497_v25 = vpop.f32.mrb[17].mxu0  ;;  %v1687_v52 = vld [vmem:[#allocation2 + $0x30] sm:$0xff] }
 0x107   : > { %619 = vst.msk [vmem:[#allocation2 + $0x40] sm:$0xff] %vm592_vm2, %v603_v22  ;;  %v498_v26 = vadd.f32 %v1600_v20, %v497_v25  ;;  %v1410_v27 = vpop.f32.mrb[18].mxu0 }
 0x108   : > { %v578_v28 = vmax.f32 %v506_v24, 0.0  ;;  %v509_v29 = vadd.f32 %v1410_v27, %v1600_v20  ;;  %v500_v30 = vpop.f32.mrb[19].mxu0 }
 0x109   : > { %v576_v31 = vmax.f32 %v498_v26, 0.0  ;;  %v501_v32 = vadd.f32 %v1600_v20, %v500_v30 }
 0x10a   : > { %671 = vrot.lane.b32.xlu1 %v1655_v21, %s1504_s26  ;;  %764 = vrot.lane.b32.xlu0 %v1655_v21, %s1507_s12  ;;  %v579_v33 = vmax.f32 %v509_v29, 0.0 }
 0x10b   : > { %v577_v34 = vmax.f32 %v501_v32, 0.0 }
 0x10c   : > { %v606_v35 = vpack.c.bf16 %v579_v33, %v578_v28  ;;  %v647_v33 = vld [vmem:[#allocation2 + $0x90] sm:$0xff] }
 0x10d   : > { %v605_v37 = vpack.c.bf16 %v577_v34, %v576_v31  ;;  %v1413_v38 = vpop.f32.mrb[20].mxu0  ;;  %v1703_v4 = vld [vmem:[#allocation2 + $0x48] sm:$0xff]  ;;  %v666_v31 = vpop.permute.xlu0 %665 }
 0x10e   : > { %770 = vrot.lane.b32.xlu1 %v1671_v36, %s1507_s12  ;;  %702 = vrot.lane.b32.xlu0 %v1655_v21, %s1506_s9  ;;  %622 = vst.msk [vmem:[#allocation2 + $0x58] sm:$0xff] %vm592_vm2, %v606_v35  ;;  %v522_v39 = vadd.f32 %v1413_v38, %v1600_v20  ;;  %v513_v40 = vpop.f32.mrb[21].mxu0  ;;  %v1719_v23 = vld [vmem:[#allocation2 + $0x40] sm:$0xff] }
 0x10f   : > { %621 = vst.msk [vmem:[#allocation2 + $0x50] sm:$0xff] %vm592_vm2, %v605_v37  ;;  %v514_v41 = vadd.f32 %v1600_v20, %v513_v40  ;;  %v1414_v42 = vpop.f32.mrb[22].mxu0 }
 0x110   : > { %v582_v43 = vmax.f32 %v522_v39, 0.0  ;;  %v525_v44 = vadd.f32 %v1414_v42, %v1600_v20  ;;  %v516_v45 = vpop.f32.mrb[23].mxu0  ;;  %v648_v39 = vld [vmem:[#allocation2 + $0x98] sm:$0xff] }
 0x111   : > { %v580_v46 = vmax.f32 %v514_v41, 0.0  ;;  %v517_v47 = vadd.f32 %v1600_v20, %v516_v45 }
 0x112   : > { %708 = vrot.lane.b32.xlu1 %v1671_v36, %s1506_s9  ;;  %739 = vrot.lane.b32.xlu0 %v1671_v36, %s1505_s8  ;;  %v583_v48 = vmax.f32 %v525_v44, 0.0  ;;  %v629_v44 = vld [vmem:[#allocation2] sm:$0xff] }
 0x113   : > { %v581_v49 = vmax.f32 %v517_v47, 0.0 }
 0x114   : > { %v608_v50 = vpack.c.bf16 %v583_v48, %v582_v43 }
 0x115   : > { %v607_v53 = vpack.c.bf16 %v581_v49, %v580_v46  ;;  %v1417_v54 = vpop.f32.mrb[24].mxu0  ;;  %v798_v46 = vsel %vm592_vm2, %v629_v44, %v666_v31 }
 0x116   : > { %737 = vrot.lane.b32.xlu1 %v1687_v52, %s1505_s8  ;;  %677 = vrot.lane.b32.xlu0 %v1671_v36, %s1504_s26  ;;  %624 = vst.msk [vmem:[#allocation2 + $0x68] sm:$0xff] %vm592_vm2, %v608_v50  ;;  %v538_v55 = vadd.f32 %v1417_v54, %v1600_v20  ;;  %v529_v56 = vpop.f32.mrb[25].mxu0  ;;  %v1741_v25 = vld [vmem:[#allocation2 + $0x50] sm:$0xff] }
 0x117   : > { %623 = vst.msk [vmem:[#allocation2 + $0x60] sm:$0xff] %vm592_vm2, %v607_v53  ;;  %v530_v57 = vadd.f32 %v1600_v20, %v529_v56  ;;  %v1418_v58 = vpop.f32.mrb[26].mxu0 }
 0x118   : > { %v586_v59 = vmax.f32 %v538_v55, 0.0  ;;  %v541_v61 = vadd.f32 %v1418_v58, %v1600_v20  ;;  %v532_v62 = vpop.f32.mrb[27].mxu0 }
 0x119   : > { %v584_v63 = vmax.f32 %v530_v57, 0.0  ;;  %v533_v0 = vadd.f32 %v1600_v20, %v532_v62 }
 0x11a   : > { %675 = vrot.lane.b32.xlu1 %v1687_v52, %s1504_s26  ;;  %768 = vrot.lane.b32.xlu0 %v1687_v52, %s1507_s12  ;;  %v587_v1 = vmax.f32 %v541_v61, 0.0 }
 0x11b   : > { %v585_v2 = vmax.f32 %v533_v0, 0.0 }
 0x11c   : > { %v610_v3 = vpack.c.bf16 %v587_v1, %v586_v59 }
 0x11d   : > { %v609_v6 = vpack.c.bf16 %v585_v2, %v584_v63  ;;  %v1421_v7 = vpop.f32.mrb[28].mxu0  ;;  %v1751_v26 = vld [vmem:[#allocation2 + $0x68] sm:$0xff] }
 0x11e   : > { %774 = vrot.lane.b32.xlu1 %v1703_v4, %s1507_s12  ;;  %706 = vrot.lane.b32.xlu0 %v1687_v52, %s1506_s9  ;;  %626 = vst.msk [vmem:[#allocation2 + $0x78] sm:$0xff] %vm592_vm2, %v610_v3  ;;  %v554_v8 = vadd.f32 %v1421_v7, %v1600_v20  ;;  %v545_v9 = vpop.f32.mrb[29].mxu0  ;;  %v1761_v27 = vld [vmem:[#allocation2 + $0x60] sm:$0xff] }
 0x11f   : > { %625 = vst.msk [vmem:[#allocation2 + $0x70] sm:$0xff] %vm592_vm2, %v609_v6  ;;  %v546_v10 = vadd.f32 %v1600_v20, %v545_v9  ;;  %v1422_v11 = vpop.f32.mrb[30].mxu0 }
 0x120   : > { %v590_v12 = vmax.f32 %v554_v8, 0.0  ;;  %v557_v13 = vadd.f32 %v1422_v11, %v1600_v20  ;;  %v548_v14 = vpop.f32.mrb[31].mxu0 }
 0x121   : > { %v588_v15 = vmax.f32 %v546_v10, 0.0  ;;  %v549_v16 = vadd.f32 %v1600_v20, %v548_v14  ;;  %v1731_v20 = vld [vmem:[#allocation2 + $0x58] sm:$0xff] }
 0x122   : > { %712 = vrot.lane.b32.xlu1 %v1703_v4, %s1506_s9  ;;  %743 = vrot.lane.b32.xlu0 %v1703_v4, %s1505_s8  ;;  %v591_v17 = vmax.f32 %v557_v13, 0.0 }
 0x123   : > { %v589_v18 = vmax.f32 %v549_v16, 0.0 }
 0x124   : > { %v612_v22 = vpack.c.bf16 %v591_v17, %v590_v12 }
 0x125   : > { %v611_v24 = vpack.c.bf16 %v589_v18, %v588_v15  ;;  %v1771_v28 = vld [vmem:[#allocation2 + $0x78] sm:$0xff] }
 0x126   : > { %741 = vrot.lane.b32.xlu1 %v1719_v23, %s1505_s8  ;;  %681 = vrot.lane.b32.xlu0 %v1703_v4, %s1504_s26  ;;  %628 = vst.msk [vmem:[#allocation2 + $0x88] sm:$0xff] %vm592_vm2, %v612_v22  ;;  %v1781_v29 = vld [vmem:[#allocation2 + $0x70] sm:$0xff] }
 0x127   : > { %627 = vst.msk [vmem:[#allocation2 + $0x80] sm:$0xff] %vm592_vm2, %v611_v24 }
 0x12a   : > { %679 = vrot.lane.b32.xlu1 %v1719_v23, %s1504_s26  ;;  %772 = vrot.lane.b32.xlu0 %v1719_v23, %s1507_s12 }
 0x12d   : > { %v646_v30 = vld [vmem:[#allocation2 + $0x88] sm:$0xff] }
 0x12e   : > { %778 = vrot.lane.b32.xlu1 %v1731_v20, %s1507_s12  ;;  %710 = vrot.lane.b32.xlu0 %v1719_v23, %s1506_s9  ;;  %v645_v32 = vld [vmem:[#allocation2 + $0x80] sm:$0xff] }
 0x132   : > { %716 = vrot.lane.b32.xlu1 %v1731_v20, %s1506_s9  ;;  %747 = vrot.lane.b32.xlu0 %v1731_v20, %s1505_s8 }
 0x136   : > { %745 = vrot.lane.b32.xlu1 %v1741_v25, %s1505_s8  ;;  %685 = vrot.lane.b32.xlu0 %v1731_v20, %s1504_s26 }
 0x13a   : > { %683 = vrot.lane.b32.xlu1 %v1741_v25, %s1504_s26  ;;  %776 = vrot.lane.b32.xlu0 %v1741_v25, %s1507_s12 }
 0x13e   : > { %782 = vrot.lane.b32.xlu1 %v1751_v26, %s1507_s12  ;;  %714 = vrot.lane.b32.xlu0 %v1741_v25, %s1506_s9 }
 0x142   : > { %720 = vrot.lane.b32.xlu1 %v1751_v26, %s1506_s9  ;;  %751 = vrot.lane.b32.xlu0 %v1751_v26, %s1505_s8 }
 0x146   : > { %749 = vrot.lane.b32.xlu1 %v1761_v27, %s1505_s8  ;;  %689 = vrot.lane.b32.xlu0 %v1751_v26, %s1504_s26 }
 0x14a   : > { %687 = vrot.lane.b32.xlu1 %v1761_v27, %s1504_s26  ;;  %780 = vrot.lane.b32.xlu0 %v1761_v27, %s1507_s12 }
 0x14e   : > { %786 = vrot.lane.b32.xlu1 %v1771_v28, %s1507_s12  ;;  %718 = vrot.lane.b32.xlu0 %v1761_v27, %s1506_s9 }
 0x152   : > { %724 = vrot.lane.b32.xlu1 %v1771_v28, %s1506_s9  ;;  %755 = vrot.lane.b32.xlu0 %v1771_v28, %s1505_s8 }
 0x156   : > { %753 = vrot.lane.b32.xlu1 %v1781_v29, %s1505_s8  ;;  %693 = vrot.lane.b32.xlu0 %v1771_v28, %s1504_s26 }
 0x15a   : > { %691 = vrot.lane.b32.xlu1 %v1781_v29, %s1504_s26  ;;  %784 = vrot.lane.b32.xlu0 %v1781_v29, %s1507_s12 }
 0x15e   : > { %790 = vrot.lane.b32.xlu1 %v646_v30, %s1507_s12  ;;  %722 = vrot.lane.b32.xlu0 %v1781_v29, %s1506_s9 }
 0x162   : > { %728 = vrot.lane.b32.xlu1 %v646_v30, %s1506_s9  ;;  %759 = vrot.lane.b32.xlu0 %v646_v30, %s1505_s8 }
 0x166   : > { %757 = vrot.lane.b32.xlu1 %v645_v32, %s1505_s8  ;;  %788 = vrot.lane.b32.xlu0 %v645_v32, %s1507_s12 }
 0x168   : > { %v732_v34 = vpop.permute.xlu0 %731  ;;  %v701_v35 = vpop.permute.xlu1 %700 }
 0x16a   : > { %761 = vrot.lane.b32.xlu1 %v647_v33, %s1505_s8  ;;  %726 = vrot.lane.b32.xlu0 %v645_v32, %s1506_s9 }
 0x16c   : > { %v670_v37 = vpop.permute.xlu0 %669  ;;  %v699_v38 = vpop.permute.xlu1 %698 }
 0x16d   : > { %v846_v49 = vsel %vm844_vm4, %v798_v46, %v699_v38  ;;  %v804_v0 = vsel %vm592_vm2, %v1629_v60, %v670_v37 }
 0x16e   : > { %695 = vrot.lane.b32.xlu1 %v645_v32, %s1504_s26  ;;  %792 = vrot.lane.b32.xlu0 %v647_v33, %s1507_s12  ;;  %v879_v56 = vsel %vm877_vm5, %v846_v49, %v732_v34 }
 0x170   : > { %v767_v40 = vpop.permute.xlu1 %766  ;;  %v668_v41 = vpop.permute.xlu0 %667 }
 0x171   : > { %v801_v45 = vsel %vm592_vm2, %v1593_v19, %v668_v41 }
 0x172   : > { %794 = vrot.lane.b32.xlu1 %v648_v39, %s1507_s12  ;;  %v848_v50 = vsel %vm844_vm4, %v801_v45, %v701_v35 }
 0x174   : > { %v705_v42 = vpop.permute.xlu1 %704  ;;  %v736_v43 = vpop.permute.xlu0 %735 }
 0x178   : > { %v734_v47 = vpop.permute.xlu1 %733  ;;  %v674_v48 = vpop.permute.xlu0 %673 }
 0x179   : > { %v881_v53 = vsel %vm877_vm5, %v848_v50, %v734_v47  ;;  %v810_v16 = vsel %vm592_vm2, %v1655_v21, %v674_v48 }
 0x17a   : > { %v914_v19 = vsel %vm910_vm6, %v881_v53, %v767_v40 }
 0x17c   : > { %v672_v54 = vpop.permute.xlu1 %671  ;;  %v765_v55 = vpop.permute.xlu0 %764 }
 0x17d   : > { %v912_v57 = vsel %vm910_vm6, %v879_v56, %v765_v55  ;;  %v807_v63 = vsel %vm592_vm2, %v1618_v51, %v672_v54 }
 0x17e   : > { %1429 = vmatprep.mubr.msk.bf16.mxu1 %vm970_vm7, %v912_v57  ;;  %v852_v6 = vsel %vm844_vm4, %v807_v63, %v705_v42 }
 0x17f   : > { %1430 = vmatmul.mubr.msk.bf16.vlgmr.msra.gmra.mrb[0].mxu1 %vm970_vm7, %v914_v19 }
 0x180   : > { %v771_v58 = vpop.permute.xlu1 %770  ;;  %v703_v59 = vpop.permute.xlu0 %702 }
 0x181   : > { %v850_v3 = vsel %vm844_vm4, %v804_v0, %v703_v59 }
 0x182   : > { %v883_v10 = vsel %vm877_vm5, %v850_v3, %v736_v43 }
 0x184   : > { %v709_v61 = vpop.permute.xlu1 %708  ;;  %v740_v62 = vpop.permute.xlu0 %739 }
 0x188   : > { %v738_v1 = vpop.permute.xlu1 %737  ;;  %v678_v2 = vpop.permute.xlu0 %677 }
 0x189   : > { %v885_v7 = vsel %vm877_vm5, %v852_v6, %v738_v1  ;;  %v816_v40 = vsel %vm592_vm2, %v1687_v52, %v678_v2 }
 0x18a   : > { %v918_v51 = vsel %vm910_vm6, %v885_v7, %v771_v58 }
 0x18c   : > { %v676_v8 = vpop.permute.xlu1 %675  ;;  %v769_v9 = vpop.permute.xlu0 %768 }
 0x18d   : > { %v916_v11 = vsel %vm910_vm6, %v883_v10, %v769_v9  ;;  %v813_v15 = vsel %vm592_vm2, %v1639_v5, %v676_v8 }
 0x18e   : > { %1433 = vmatprep.mubr.msk.bf16.mxu1 %vm970_vm7, %v916_v11  ;;  %v856_v24 = vsel %vm844_vm4, %v813_v15, %v709_v61 }
 0x18f   : > { %1434 = vmatmul.mubr.msk.bf16.gmra.mrb[4].mxu1 %vm970_vm7, %v918_v51 }
 0x190   : > { %v775_v60 = vpop.permute.xlu1 %774  ;;  %v707_v12 = vpop.permute.xlu0 %706 }
 0x191   : > { %v854_v22 = vsel %vm844_vm4, %v810_v16, %v707_v12 }
 0x192   : > { %v887_v32 = vsel %vm877_vm5, %v854_v22, %v740_v62 }
 0x194   : > { %v713_v13 = vpop.permute.xlu1 %712  ;;  %v744_v14 = vpop.permute.xlu0 %743 }
 0x198   : > { %v742_v17 = vpop.permute.xlu1 %741  ;;  %v682_v18 = vpop.permute.xlu0 %681 }
 0x199   : > { %v889_v30 = vsel %vm877_vm5, %v856_v24, %v742_v17  ;;  %v822_v56 = vsel %vm592_vm2, %v1719_v23, %v682_v18 }
 0x19a   : > { %v922_v5 = vsel %vm910_vm6, %v889_v30, %v775_v60 }
 0x19c   : > { %v680_v31 = vpop.permute.xlu1 %679  ;;  %v773_v33 = vpop.permute.xlu0 %772 }
 0x19d   : > { %v920_v34 = vsel %vm910_vm6, %v887_v32, %v773_v33  ;;  %v819_v39 = vsel %vm592_vm2, %v1671_v36, %v680_v31 }
 0x19e   : > { %1437 = vmatprep.mubr.msk.bf16.mxu1 %vm970_vm7, %v920_v34  ;;  %v860_v44 = vsel %vm844_vm4, %v819_v39, %v713_v13 }
 0x19f   : > { %1438 = vmatmul.mubr.msk.bf16.gmra.mrb[8].mxu1 %vm970_vm7, %v922_v5 }
 0x1a0   : > { %v779_v21 = vpop.permute.xlu1 %778  ;;  %v711_v35 = vpop.permute.xlu0 %710 }
 0x1a1   : > { %v858_v43 = vsel %vm844_vm4, %v816_v40, %v711_v35 }
 0x1a2   : > { %v891_v47 = vsel %vm877_vm5, %v858_v43, %v744_v14 }
 0x1a4   : > { %v717_v37 = vpop.permute.xlu1 %716  ;;  %v748_v38 = vpop.permute.xlu0 %747 }
 0x1a8   : > { %v746_v41 = vpop.permute.xlu1 %745  ;;  %v686_v42 = vpop.permute.xlu0 %685 }
 0x1a9   : > { %v893_v45 = vsel %vm877_vm5, %v860_v44, %v746_v41  ;;  %v828_v8 = vsel %vm592_vm2, %v1741_v25, %v686_v42 }
 0x1aa   : > { %v926_v36 = vsel %vm910_vm6, %v893_v45, %v779_v21 }
 0x1ac   : > { %v684_v46 = vpop.permute.xlu1 %683  ;;  %v777_v48 = vpop.permute.xlu0 %776 }
 0x1ad   : > { %v924_v49 = vsel %vm910_vm6, %v891_v47, %v777_v48  ;;  %v825_v55 = vsel %vm592_vm2, %v1703_v4, %v684_v46  ;;  %v1901_v47 = vld [vmem:[%s2012_s4] ss:$0 sm:$0xff] }
 0x1ae   : > { %1441 = vmatprep.mubr.msk.bf16.mxu1 %vm970_vm7, %v924_v49  ;;  %v864_v59 = vsel %vm844_vm4, %v825_v55, %v717_v37 }
 0x1af   : > { %1442 = vmatmul.mubr.msk.bf16.gmra.mrb[12].mxu1 %vm970_vm7, %v926_v36 }
 0x1b0   : > { %v783_v52 = vpop.permute.xlu1 %782  ;;  %v715_v50 = vpop.permute.xlu0 %714 }
 0x1b1   : > { %v862_v58 = vsel %vm844_vm4, %v822_v56, %v715_v50 }
 0x1b2   : > { %v895_v63 = vsel %vm877_vm5, %v862_v58, %v748_v38 }
 0x1b4   : > { %v721_v53 = vpop.permute.xlu1 %720  ;;  %v752_v54 = vpop.permute.xlu0 %751 }
 0x1b8   : > { %v750_v57 = vpop.permute.xlu1 %749  ;;  %v690_v19 = vpop.permute.xlu0 %689 }
 0x1b9   : > { %v897_v61 = vsel %vm877_vm5, %v864_v59, %v750_v57  ;;  %v834_v17 = vsel %vm592_vm2, %v1761_v27, %v690_v19 }
 0x1ba   : > { %v930_v4 = vsel %vm910_vm6, %v897_v61, %v783_v52 }
 0x1bc   : > { %v688_v62 = vpop.permute.xlu1 %687  ;;  %v781_v0 = vpop.permute.xlu0 %780 }
 0x1bd   : > { %v928_v1 = vsel %vm910_vm6, %v895_v63, %v781_v0  ;;  %v831_v7 = vsel %vm592_vm2, %v1731_v20, %v688_v62 }
 0x1be   : > { %1445 = vmatprep.mubr.msk.bf16.mxu1 %vm970_vm7, %v928_v1  ;;  %v868_v51 = vsel %vm844_vm4, %v831_v7, %v721_v53 }
 0x1bf   : > { %1446 = vmatmul.mubr.msk.bf16.gmra.mrb[16].mxu1 %vm970_vm7, %v930_v4 }
 0x1c0   : > { %v787_v23 = vpop.permute.xlu1 %786  ;;  %v719_v2 = vpop.permute.xlu0 %718 }
 0x1c1   : > { %v866_v11 = vsel %vm844_vm4, %v828_v8, %v719_v2 }
 0x1c2   : > { %v899_v13 = vsel %vm877_vm5, %v866_v11, %v752_v54 }
 0x1c4   : > { %v725_v3 = vpop.permute.xlu1 %724  ;;  %v756_v6 = vpop.permute.xlu0 %755 }
 0x1c8   : > { %v754_v9 = vpop.permute.xlu1 %753  ;;  %v694_v10 = vpop.permute.xlu0 %693 }
 0x1c9   : > { %v901_v60 = vsel %vm877_vm5, %v868_v51, %v754_v9 }
 0x1ca   : > { %v934_v20 = vsel %vm910_vm6, %v901_v60, %v787_v23 }
 0x1cc   : > { %v692_v12 = vpop.permute.xlu1 %691  ;;  %v785_v14 = vpop.permute.xlu0 %784 }
 0x1cd   : > { %v932_v15 = vsel %vm910_vm6, %v899_v13, %v785_v14  ;;  %v837_v24 = vsel %vm592_vm2, %v1751_v26, %v692_v12  ;;  %v840_v26 = vsel %vm592_vm2, %v1781_v29, %v694_v10 }
 0x1ce   : > { %1449 = vmatprep.mubr.msk.bf16.mxu1 %vm970_vm7, %v932_v15  ;;  %v872_v31 = vsel %vm844_vm4, %v837_v24, %v725_v3 }
 0x1cf   : > { %1450 = vmatmul.mubr.msk.bf16.gmra.mrb[20].mxu1 %vm970_vm7, %v934_v20 }
 0x1d0   : > { %v791_v25 = vpop.permute.xlu1 %790  ;;  %v723_v16 = vpop.permute.xlu0 %722 }
 0x1d1   : > { %v870_v30 = vsel %vm844_vm4, %v834_v17, %v723_v16 }
 0x1d2   : > { %v903_v33 = vsel %vm877_vm5, %v870_v30, %v756_v6 }
 0x1d4   : > { %v729_v18 = vpop.permute.xlu1 %728  ;;  %v760_v22 = vpop.permute.xlu0 %759 }
 0x1d8   : > { %v758_v32 = vpop.permute.xlu1 %757  ;;  %v789_v34 = vpop.permute.xlu0 %788 }
 0x1d9   : > { %v905_v5 = vsel %vm877_vm5, %v872_v31, %v758_v32  ;;  %v936_v21 = vsel %vm910_vm6, %v903_v33, %v789_v34 }
 0x1da   : > { %1453 = vmatprep.mubr.msk.bf16.mxu1 %vm970_vm7, %v936_v21  ;;  %v938_v27 = vsel %vm910_vm6, %v905_v5, %v791_v25 }
 0x1db   : > { %1454 = vmatmul.mubr.msk.bf16.gmra.mrb[24].mxu1 %vm970_vm7, %v938_v27 }
 0x1dc   : > { %v762_v35 = vpop.permute.xlu1 %761  ;;  %v727_v37 = vpop.permute.xlu0 %726 }
 0x1dd   : > { %v874_v38 = vsel %vm844_vm4, %v840_v26, %v727_v37 }
 0x1de   : > { %v907_v40 = vsel %vm877_vm5, %v874_v38, %v760_v22 }
 0x1e0   : > { %v696_v39 = vpop.permute.xlu1 %695  ;;  %v793_v41 = vpop.permute.xlu0 %792 }
 0x1e1   : > { %v843_v42 = vsel %vm592_vm2, %v1771_v28, %v696_v39  ;;  %v940_v43 = vsel %vm910_vm6, %v907_v40, %v793_v41 }
 0x1e2   : > { %v876_v44 = vsel %vm844_vm4, %v843_v42, %v729_v18  ;;  %1457 = vmatprep.mubr.msk.bf16.mxu1 %vm970_vm7, %v940_v43 }
 0x1e3   : > { %v909_v29 = vsel %vm877_vm5, %v876_v44, %v762_v35 }
 0x1e4   : > { %v795_v45 = vpop.permute.xlu1 %794 }
 0x1e5   : > { %v942_v46 = vsel %vm910_vm6, %v909_v29, %v795_v45 }
 0x1e6   : > { %1458 = vmatmul.mubr.msk.bf16.gmra.mrb[28].mxu1 %vm970_vm7, %v942_v46 }
 0x252   : > { %v1431_v28 = vpop.f32.mrb[0].mxu1 }
 0x253   : > { %v1050_v48 = vadd.f32 %v1431_v28, %v1901_v47  ;;  %v1041_v49 = vpop.f32.mrb[1].mxu1 }
 0x254   : > { %v1042_v36 = vadd.f32 %v1901_v47, %v1041_v49  ;;  %v1432_v52 = vpop.f32.mrb[2].mxu1 }
 0x255   : > { %v1170_v50 = vmax.f32 %v1050_v48, 0.0  ;;  %v1053_v53 = vadd.f32 %v1432_v52, %v1901_v47  ;;  %v1044_v54 = vpop.f32.mrb[3].mxu1 }
 0x256   : > { %v1168_v55 = vmax.f32 %v1042_v36, 0.0  ;;  %v1045_v56 = vadd.f32 %v1901_v47, %v1044_v54 }
 0x257   : > { %1202 = vst.msk [vmem:[%s1908_s20 + $0x10] sm:$0xff] %vm592_vm2, %v1170_v50  ;;  %v1171_v57 = vmax.f32 %v1053_v53, 0.0 }
 0x258   : > { %1200 = vst.msk [vmem:[%s1908_s20] sm:$0xff] %vm592_vm2, %v1168_v55  ;;  %v1169_v19 = vmax.f32 %v1045_v56, 0.0 }
 0x259   : > { %1203 = vst.msk [vmem:[%s1908_s20 + $0x18] sm:$0xff] %vm592_vm2, %v1171_v57 }
 0x25a   : > { %1201 = vst.msk [vmem:[%s1908_s20 + $0x8] sm:$0xff] %vm592_vm2, %v1169_v19 }
 0x262   : > { %v1435_v58 = vpop.f32.mrb[4].mxu1 }
 0x263   : > { %v1066_v59 = vadd.f32 %v1435_v58, %v1901_v47  ;;  %v1057_v61 = vpop.f32.mrb[5].mxu1 }
 0x264   : > { %v1058_v62 = vadd.f32 %v1901_v47, %v1057_v61  ;;  %v1436_v63 = vpop.f32.mrb[6].mxu1 }
 0x265   : > { %v1174_v0 = vmax.f32 %v1066_v59, 0.0  ;;  %v1069_v1 = vadd.f32 %v1436_v63, %v1901_v47  ;;  %v1060_v4 = vpop.f32.mrb[7].mxu1 }
 0x266   : > { %v1172_v23 = vmax.f32 %v1058_v62, 0.0  ;;  %v1061_v2 = vadd.f32 %v1901_v47, %v1060_v4 }
 0x267   : > { %1206 = vst.msk [vmem:[%s1908_s20 + $0x30] sm:$0xff] %vm592_vm2, %v1174_v0  ;;  %v1175_v3 = vmax.f32 %v1069_v1, 0.0 }
 0x268   : > { %1204 = vst.msk [vmem:[%s1908_s20 + $0x20] sm:$0xff] %vm592_vm2, %v1172_v23  ;;  %v1173_v6 = vmax.f32 %v1061_v2, 0.0 }
 0x269   : > { %1207 = vst.msk [vmem:[%s1908_s20 + $0x38] sm:$0xff] %vm592_vm2, %v1175_v3 }
 0x26a   : > { %1205 = vst.msk [vmem:[%s1908_s20 + $0x28] sm:$0xff] %vm592_vm2, %v1173_v6 }
 0x272   : > { %v1439_v7 = vpop.f32.mrb[8].mxu1 }
 0x273   : > { %v1082_v8 = vadd.f32 %v1439_v7, %v1901_v47  ;;  %v1073_v9 = vpop.f32.mrb[9].mxu1 }
 0x274   : > { %v1074_v10 = vadd.f32 %v1901_v47, %v1073_v9  ;;  %v1440_v11 = vpop.f32.mrb[10].mxu1 }
 0x275   : > { %v1178_v51 = vmax.f32 %v1082_v8, 0.0  ;;  %v1085_v60 = vadd.f32 %v1440_v11, %v1901_v47  ;;  %v1076_v12 = vpop.f32.mrb[11].mxu1 }
 0x276   : > { %v1176_v13 = vmax.f32 %v1074_v10, 0.0  ;;  %v1077_v14 = vadd.f32 %v1901_v47, %v1076_v12 }
 0x277   : > { %1210 = vst.msk [vmem:[%s1908_s20 + $0x50] sm:$0xff] %vm592_vm2, %v1178_v51  ;;  %v1179_v15 = vmax.f32 %v1085_v60, 0.0 }
 0x278   : > { %1208 = vst.msk [vmem:[%s1908_s20 + $0x40] sm:$0xff] %vm592_vm2, %v1176_v13  ;;  %v1177_v20 = vmax.f32 %v1077_v14, 0.0 }
 0x279   : > { %1211 = vst.msk [vmem:[%s1908_s20 + $0x58] sm:$0xff] %vm592_vm2, %v1179_v15 }
 0x27a   : > { %1209 = vst.msk [vmem:[%s1908_s20 + $0x48] sm:$0xff] %vm592_vm2, %v1177_v20 }
 0x282   : > { %v1443_v25 = vpop.f32.mrb[12].mxu1 }
 0x283   : > { %v1098_v16 = vadd.f32 %v1443_v25, %v1901_v47  ;;  %v1089_v17 = vpop.f32.mrb[13].mxu1 }
 0x284   : > { %v1090_v18 = vadd.f32 %v1901_v47, %v1089_v17  ;;  %v1444_v22 = vpop.f32.mrb[14].mxu1 }
 0x285   : > { %v1182_v24 = vmax.f32 %v1098_v16, 0.0  ;;  %v1101_v30 = vadd.f32 %v1444_v22, %v1901_v47  ;;  %v1092_v31 = vpop.f32.mrb[15].mxu1 }
 0x286   : > { %v1180_v32 = vmax.f32 %v1090_v18, 0.0  ;;  %v1093_v33 = vadd.f32 %v1901_v47, %v1092_v31 }
 0x287   : > { %1214 = vst.msk [vmem:[%s1908_s20 + $0x70] sm:$0xff] %vm592_vm2, %v1182_v24  ;;  %v1183_v34 = vmax.f32 %v1101_v30, 0.0 }
 0x288   : > { %1212 = vst.msk [vmem:[%s1908_s20 + $0x60] sm:$0xff] %vm592_vm2, %v1180_v32  ;;  %v1181_v5 = vmax.f32 %v1093_v33, 0.0 }
 0x289   : > { %1215 = vst.msk [vmem:[%s1908_s20 + $0x78] sm:$0xff] %vm592_vm2, %v1183_v34 }
 0x28a   : > { %1213 = vst.msk [vmem:[%s1908_s20 + $0x68] sm:$0xff] %vm592_vm2, %v1181_v5 }
 0x292   : > { %v1447_v21 = vpop.f32.mrb[16].mxu1 }
 0x293   : > { %v1114_v27 = vadd.f32 %v1447_v21, %v1901_v47  ;;  %v1105_v26 = vpop.f32.mrb[17].mxu1 }
 0x294   : > { %v1106_v35 = vadd.f32 %v1901_v47, %v1105_v26  ;;  %v1448_v37 = vpop.f32.mrb[18].mxu1 }
 0x295   : > { %v1186_v38 = vmax.f32 %v1114_v27, 0.0  ;;  %v1117_v39 = vadd.f32 %v1448_v37, %v1901_v47  ;;  %v1108_v40 = vpop.f32.mrb[19].mxu1 }
 0x296   : > { %v1184_v41 = vmax.f32 %v1106_v35, 0.0  ;;  %v1109_v42 = vadd.f32 %v1901_v47, %v1108_v40 }
 0x297   : > { %1218 = vst.msk [vmem:[%s1908_s20 + $0x90] sm:$0xff] %vm592_vm2, %v1186_v38  ;;  %v1187_v43 = vmax.f32 %v1117_v39, 0.0 }
 0x298   : > { %1216 = vst.msk [vmem:[%s1908_s20 + $0x80] sm:$0xff] %vm592_vm2, %v1184_v41  ;;  %v1185_v44 = vmax.f32 %v1109_v42, 0.0 }
 0x299   : > { %1219 = vst.msk [vmem:[%s1908_s20 + $0x98] sm:$0xff] %vm592_vm2, %v1187_v43 }
 0x29a   : > { %1217 = vst.msk [vmem:[%s1908_s20 + $0x88] sm:$0xff] %vm592_vm2, %v1185_v44 }
 0x2a2   : > { %v1451_v29 = vpop.f32.mrb[20].mxu1 }
 0x2a3   : > { %v1130_v45 = vadd.f32 %v1451_v29, %v1901_v47  ;;  %v1121_v46 = vpop.f32.mrb[21].mxu1 }
 0x2a4   : > { %v1122_v28 = vadd.f32 %v1901_v47, %v1121_v46  ;;  %v1452_v48 = vpop.f32.mrb[22].mxu1 }
 0x2a5   : > { %v1190_v49 = vmax.f32 %v1130_v45, 0.0  ;;  %v1133_v36 = vadd.f32 %v1452_v48, %v1901_v47  ;;  %v1124_v52 = vpop.f32.mrb[23].mxu1 }
 0x2a6   : > { %v1188_v50 = vmax.f32 %v1122_v28, 0.0  ;;  %v1125_v53 = vadd.f32 %v1901_v47, %v1124_v52 }
 0x2a7   : > { %1222 = vst.msk [vmem:[%s1908_s20 + $0xb0] sm:$0xff] %vm592_vm2, %v1190_v49  ;;  %v1191_v54 = vmax.f32 %v1133_v36, 0.0 }
 0x2a8   : > { %1220 = vst.msk [vmem:[%s1908_s20 + $0xa0] sm:$0xff] %vm592_vm2, %v1188_v50  ;;  %v1189_v55 = vmax.f32 %v1125_v53, 0.0 }
 0x2a9   : > { %1223 = vst.msk [vmem:[%s1908_s20 + $0xb8] sm:$0xff] %vm592_vm2, %v1191_v54 }
 0x2aa   : > { %1221 = vst.msk [vmem:[%s1908_s20 + $0xa8] sm:$0xff] %vm592_vm2, %v1189_v55 }
 0x2ae   : > { %v1455_v56 = vpop.f32.mrb[24].mxu1 }
 0x2af   : > { %v1146_v57 = vadd.f32 %v1455_v56, %v1901_v47  ;;  %v1137_v19 = vpop.f32.mrb[25].mxu1 }
 0x2b0   : > { %v1138_v58 = vadd.f32 %v1901_v47, %v1137_v19  ;;  %v1456_v59 = vpop.f32.mrb[26].mxu1 }
 0x2b1   : > { %v1194_v61 = vmax.f32 %v1146_v57, 0.0  ;;  %v1149_v62 = vadd.f32 %v1456_v59, %v1901_v47  ;;  %v1140_v63 = vpop.f32.mrb[27].mxu1 }
 0x2b2   : > { %v1192_v0 = vmax.f32 %v1138_v58, 0.0  ;;  %v1141_v1 = vadd.f32 %v1901_v47, %v1140_v63 }
 0x2b3   : > { %1226 = vst.msk [vmem:[%s1908_s20 + $0xd0] sm:$0xff] %vm592_vm2, %v1194_v61  ;;  %v1195_v4 = vmax.f32 %v1149_v62, 0.0 }
 0x2b4   : > { %1224 = vst.msk [vmem:[%s1908_s20 + $0xc0] sm:$0xff] %vm592_vm2, %v1192_v0  ;;  %v1193_v23 = vmax.f32 %v1141_v1, 0.0 }
 0x2b5   : > { %1227 = vst.msk [vmem:[%s1908_s20 + $0xd8] sm:$0xff] %vm592_vm2, %v1195_v4 }
 0x2b6   : > { %1225 = vst.msk [vmem:[%s1908_s20 + $0xc8] sm:$0xff] %vm592_vm2, %v1193_v23 }
 0x2b9   : > { %v1459_v2 = vpop.f32.mrb[28].mxu1 }
 0x2ba   : > { %v1162_v3 = vadd.f32 %v1459_v2, %v1901_v47  ;;  %v1153_v6 = vpop.f32.mrb[29].mxu1 }
 0x2bb   : > { %v1154_v7 = vadd.f32 %v1901_v47, %v1153_v6  ;;  %v1460_v8 = vpop.f32.mrb[30].mxu1 }
 0x2bc   : > { %v1198_v9 = vmax.f32 %v1162_v3, 0.0  ;;  %v1165_v10 = vadd.f32 %v1460_v8, %v1901_v47  ;;  %v1156_v11 = vpop.f32.mrb[31].mxu1 }
 0x2bd   : > { %v1196_v51 = vmax.f32 %v1154_v7, 0.0  ;;  %v1157_v60 = vadd.f32 %v1901_v47, %v1156_v11 }
 0x2be   : > { %1230 = vst.msk [vmem:[%s1908_s20 + $0xf0] sm:$0xff] %vm592_vm2, %v1198_v9  ;;  %v1199_v12 = vmax.f32 %v1165_v10, 0.0 }
 0x2bf   : > { %1228 = vst.msk [vmem:[%s1908_s20 + $0xe0] sm:$0xff] %vm592_vm2, %v1196_v51  ;;  %v1197_v13 = vmax.f32 %v1157_v60, 0.0 }
 0x2c0   : > { %1231 = vst.msk [vmem:[%s1908_s20 + $0xf8] sm:$0xff] %vm592_vm2, %v1199_v12 }
 0x2c1   : > { %1229 = vst.msk [vmem:[%s1908_s20 + $0xe8] sm:$0xff] %vm592_vm2, %v1197_v13 }
 0x2c2 PF: > { %s15_s18 = sadd.s32 1, %s1501_s18  }
 0x2c3   : > { %p12_p4 = scmp.ge.s32.totalorder %s15_s18, 4  }
 0x2c5   :  { %14 = sbr.rel (!%p12_p4) target bundleno = 1 (0x1), region = 70 }

</bundles_post_ra>
